<compile_context>
chip_gen: v5e
topology: v5e:2x2
jax: 0.10.0
libtpu: 0.0.40
codegen_flags: <defaults>
</compile_context>

<pallas_src>
import jax
import jax.numpy as jnp
from jax.experimental import pallas as pl
from jax.experimental.pallas import tpu as pltpu


def _round_up(x, m):
    return (x + m - 1) // m * m


def mlp_kernel(x_ref, w1_ref, b1_ref, w2_ref, b2_ref, o_ref):
    """Fused relu(x @ w1 + b1) @ w2 + b2; both dots on the MXU, f32 accum."""
    x = x_ref[...]                                                   # (TB, D_in)
    h = jnp.dot(x, w1_ref[...], preferred_element_type=jnp.float32)  # (TB, H) f32
    h = jnp.maximum(h + b1_ref[...], 0.0)                            # f32 bias + ReLU
    y = jnp.dot(h.astype(w2_ref.dtype), w2_ref[...],
                preferred_element_type=jnp.float32)                  # (TB, D_out) f32
    o_ref[...] = (y + b2_ref[...]).astype(o_ref.dtype)               # masked vst (10 lanes)


def prepare_params(w1, b1, w2, b2, *, compute_dtype=jnp.bfloat16):
    """One-time parameter prep (hoisted out of the per-call hot path).

    Weights are (in_features, out_features) and are cast once to the MXU
    compute dtype (bf16 by default; pass None or jnp.float32 for pure f32).
    Biases stay f32 (added after f32 accumulation) and become (1, N) rows.
    """
    wd = w1.dtype if compute_dtype is None else compute_dtype
    return (w1.astype(wd),
            b1.reshape(1, -1).astype(jnp.float32),
            w2.astype(wd),
            b2.reshape(1, -1).astype(jnp.float32))


def my_sequential_forward(x, params, *, block_batch=2048):
    """relu(x @ w1 + b1) @ w2 + b2 as one batch-tiled, fused Pallas kernel."""
    w1, b1, w2, b2 = params
    B, D_in = x.shape
    H = w1.shape[1]
    D_out = w2.shape[1]
    out_dtype = x.dtype

    # Streamed activation matches the weights' MXU dtype (bf16 by default).
    compute_dtype = w1.dtype
    if x.dtype != compute_dtype:
        x = x.astype(compute_dtype)

    # Sublane granularity of the batch tile: sub-32-bit dtypes pack sublanes.
    isz = jnp.dtype(compute_dtype).itemsize
    sub = {4: 8, 2: 16, 1: 32}.get(isz, 8)

    # Batch tile: large enough to amortize per-step overhead, but >= 2 grid
    # steps once B allows it so "parallel" shards over both v7x TensorCores.
    # The last block may be ragged; Pallas masks OOB rows, so B is not padded.
    TB = max(sub, min(block_batch, _round_up(pl.cdiv(B, 2), sub)))
    grid = (pl.cdiv(B, TB),)

    return pl.pallas_call(
        mlp_kernel,
        out_shape=jax.ShapeDtypeStruct((B, D_out), out_dtype),
        grid=grid,
        in_specs=[
            # Activation tiles stream along the batch grid (unpadded lanes).
            pl.BlockSpec((TB, D_in), lambda i: (i, 0)),
            # Parameters: same block every step -> resident in VMEM.
            pl.BlockSpec((D_in, H), lambda i: (0, 0)),
            pl.BlockSpec((1, H), lambda i: (0, 0)),
            pl.BlockSpec((H, D_out), lambda i: (0, 0)),
            pl.BlockSpec((1, D_out), lambda i: (0, 0)),
        ],
        out_specs=pl.BlockSpec((TB, D_out), lambda i: (i, 0)),
        compiler_params=pltpu.CompilerParams(
            dimension_semantics=("parallel",),  # shard batch grid over v7x's 2 TCs
        ),
    )(x, w1, b1, w2, b2)


if __name__ == "__main__":
    # Shapes implied by the module: Linear(20 -> 256), ReLU, Linear(256 -> 10)
    batch, d_in, d_hidden, d_out = 2, 20, 256, 10

    key = jax.random.PRNGKey(0)
    k_x, k_w1, k_b1, k_w2, k_b2, k_xl = jax.random.split(key, 6)

    x = jax.random.normal(k_x, (batch, d_in), dtype=jnp.float32)
    w1 = jax.random.uniform(k_w1, (d_in, d_hidden), jnp.float32,
                            minval=-1.0 / d_in ** 0.5, maxval=1.0 / d_in ** 0.5)
    b1 = jax.random.uniform(k_b1, (d_hidden,), jnp.float32,
                            minval=-1.0 / d_in ** 0.5, maxval=1.0 / d_in ** 0.5)
    w2 = jax.random.uniform(k_w2, (d_hidden, d_out), jnp.float32,
                            minval=-1.0 / d_hidden ** 0.5, maxval=1.0 / d_hidden ** 0.5)
    b2 = jax.random.uniform(k_b2, (d_out,), jnp.float32,
                            minval=-1.0 / d_hidden ** 0.5, maxval=1.0 / d_hidden ** 0.5)

    ref = jnp.maximum(x @ w1 + b1, 0.0) @ w2 + b2

    # --- f32 path: strict check -------------------------------------------
    params_f32 = prepare_params(w1, b1, w2, b2, compute_dtype=jnp.float32)
    out = jax.block_until_ready(my_sequential_forward(x, params_f32))
    assert out.shape == (batch, d_out)
    assert jnp.allclose(out, ref, atol=1e-5, rtol=1e-5)

    # --- default bf16-MXU path: looser tolerance (bf16 mantissa) ------------
    params_bf16 = prepare_params(w1, b1, w2, b2)          # bf16 weights, f32 biases
    out_bf16 = jax.block_until_ready(my_sequential_forward(x, params_bf16))
    assert out_bf16.shape == (batch, d_out)
    assert jnp.allclose(out_bf16, ref, atol=5e-2, rtol=5e-2)

    # --- larger batch: multi-step grid + ragged last block ------------------
    B_large = 300
    x_l = jax.random.normal(k_xl, (B_large, d_in), dtype=jnp.float32)
    ref_l = jnp.maximum(x_l @ w1 + b1, 0.0) @ w2 + b2
    out_l = jax.block_until_ready(
        my_sequential_forward(x_l, params_f32, block_batch=128))
    assert out_l.shape == (B_large, d_out)
    assert jnp.allclose(out_l, ref_l, atol=1e-4, rtol=1e-4)

    print("KERNEL_OK")
</pallas_src>

<mosaic_0001>
module attributes {stable_mosaic.version = 11 : i64} {
  func.func @mlp_kernel(%arg0: i32, %arg1: memref<8x20xf32, #tpu.memory_space<vmem>>, %arg2: memref<20x256xf32, #tpu.memory_space<vmem>>, %arg3: memref<1x256xf32, #tpu.memory_space<vmem>>, %arg4: memref<256x10xf32, #tpu.memory_space<vmem>>, %arg5: memref<1x10xf32, #tpu.memory_space<vmem>>, %arg6: memref<8x10xf32, #tpu.memory_space<vmem>>) attributes {dimension_semantics = [#tpu.dimension_semantics<parallel>], iteration_bounds = array<i64: 1>, scalar_prefetch = 0 : i64, scratch_operands = 0 : i64, tpu.core_type = #tpu.core_type<tc>, window_params = [{transform_indices = @transform_0, window_bounds = array<i64: 8, 20>}, {pipeline_mode = #tpu.pipeline_mode<synchronous>, transform_indices = @transform_1, window_bounds = array<i64: 20, 256>}, {pipeline_mode = #tpu.pipeline_mode<synchronous>, transform_indices = @transform_2, window_bounds = array<i64: 1, 256>}, {pipeline_mode = #tpu.pipeline_mode<synchronous>, transform_indices = @transform_3, window_bounds = array<i64: 256, 10>}, {pipeline_mode = #tpu.pipeline_mode<synchronous>, transform_indices = @transform_4, window_bounds = array<i64: 1, 10>}, {transform_indices = @transform_5, window_bounds = array<i64: 8, 10>}]} {
    %c0 = arith.constant 0 : index
    %c0_0 = arith.constant 0 : index
    %0 = vector.load %arg1[%c0, %c0_0] : memref<8x20xf32, #tpu.memory_space<vmem>>, vector<8x20xf32>
    %c0_1 = arith.constant 0 : index
    %c0_2 = arith.constant 0 : index
    %1 = vector.load %arg2[%c0_1, %c0_2] : memref<20x256xf32, #tpu.memory_space<vmem>>, vector<20x256xf32>
    %cst = arith.constant dense<0.000000e+00> : vector<8x256xf32>
    %2 = tpu.matmul %0, %1, %cst {dimension_numbers = #tpu.dot_dimension_numbers<[1], [0], [0], [1], [0, 0, 1, 1], [], []>} : vector<8x20xf32>, vector<20x256xf32>, vector<8x256xf32> -> vector<8x256xf32>
    %c0_3 = arith.constant 0 : index
    %c0_4 = arith.constant 0 : index
    %3 = vector.load %arg3[%c0_3, %c0_4] : memref<1x256xf32, #tpu.memory_space<vmem>>, vector<1x256xf32>
    %4 = vector.broadcast %3 : vector<1x256xf32> to vector<8x256xf32>
    %5 = arith.addf %2, %4 : vector<8x256xf32>
    %cst_5 = arith.constant 0.000000e+00 : f32
    %6 = vector.broadcast %cst_5 : f32 to vector<8x256xf32>
    %7 = arith.maximumf %5, %6 : vector<8x256xf32>
    %c0_6 = arith.constant 0 : index
    %c0_7 = arith.constant 0 : index
    %8 = vector.load %arg4[%c0_6, %c0_7] : memref<256x10xf32, #tpu.memory_space<vmem>>, vector<256x10xf32>
    %cst_8 = arith.constant dense<0.000000e+00> : vector<8x10xf32>
    %9 = tpu.matmul %7, %8, %cst_8 {dimension_numbers = #tpu.dot_dimension_numbers<[1], [0], [0], [1], [0, 0, 1, 1], [], []>} : vector<8x256xf32>, vector<256x10xf32>, vector<8x10xf32> -> vector<8x10xf32>
    %c0_9 = arith.constant 0 : index
    %c0_10 = arith.constant 0 : index
    %10 = vector.load %arg5[%c0_9, %c0_10] : memref<1x10xf32, #tpu.memory_space<vmem>>, vector<1x10xf32>
    %11 = vector.broadcast %10 : vector<1x10xf32> to vector<8x10xf32>
    %12 = arith.addf %9, %11 : vector<8x10xf32>
    %c0_11 = arith.constant 0 : index
    %c0_12 = arith.constant 0 : index
    %13 = vector.load %arg6[%c0_11, %c0_12] : memref<8x10xf32, #tpu.memory_space<vmem>>, vector<8x10xf32>
    tpu.vector_store %arg6[%c0_11, %c0_12], %12 {strides = array<i32>} : memref<8x10xf32, #tpu.memory_space<vmem>>, vector<8x10xf32>,
    return
  }
  func.func @transform_0(%arg0: i32) -> (i32, i32) {
    %c0_i32 = arith.constant 0 : i32
    %c0_i32_0 = arith.constant 0 : i32
    return %arg0, %c0_i32 : i32, i32
  }
  func.func @transform_1(%arg0: i32) -> (i32, i32) {
    %c0_i32 = arith.constant 0 : i32
    %c0_i32_0 = arith.constant 0 : i32
    %c0_i32_1 = arith.constant 0 : i32
    return %c0_i32, %c0_i32_0 : i32, i32
  }
  func.func @transform_2(%arg0: i32) -> (i32, i32) {
    %c0_i32 = arith.constant 0 : i32
    %c0_i32_0 = arith.constant 0 : i32
    %c0_i32_1 = arith.constant 0 : i32
    return %c0_i32, %c0_i32_0 : i32, i32
  }
  func.func @transform_3(%arg0: i32) -> (i32, i32) {
    %c0_i32 = arith.constant 0 : i32
    %c0_i32_0 = arith.constant 0 : i32
    %c0_i32_1 = arith.constant 0 : i32
    return %c0_i32, %c0_i32_0 : i32, i32
  }
  func.func @transform_4(%arg0: i32) -> (i32, i32) {
    %c0_i32 = arith.constant 0 : i32
    %c0_i32_0 = arith.constant 0 : i32
    %c0_i32_1 = arith.constant 0 : i32
    return %c0_i32, %c0_i32_0 : i32, i32
  }
  func.func @transform_5(%arg0: i32) -> (i32, i32) {
    %c0_i32 = arith.constant 0 : i32
    %c0_i32_0 = arith.constant 0 : i32
    return %arg0, %c0_i32 : i32, i32
  }
}

</mosaic_0001>

<bundles_post_ra>
// kernel: tpu_custom_call.1
= control target key start
LH: loop header
LB: loop body
LE: loop exit
PB: predicated region body
PF: predicated region fallthrough
CT: control target
= control target key end

     0   :  { %10 = vsyncpa [#allocation3], 0  ;;  %vm38_vm0 = vcmask 1043456   ;;  %vm34_vm1 = vcmask 162816   ;;  %vm163_vm2 = vcmask 80896   ;;  %s376_s0 = inlined_call_operand.vmem [shape: f32[2,20], index: 0, kind: input, shape index: {}]   ;;  %s377_s1 = inlined_call_operand.vmem [shape: f32[20,256], index: 1, kind: input, shape index: {}]   ;;  %s378_s2 = inlined_call_operand.vmem [shape: f32[1,256], index: 2, kind: input, shape index: {}]   ;;  %s379_s3 = inlined_call_operand.vmem [shape: f32[256,10], index: 3, kind: input, shape index: {}]   ;;  %s380_s4 = inlined_call_operand.vmem [shape: f32[1,10], index: 4, kind: input, shape index: {}]   ;;  %s381_s5 = inlined_call_operand.hbm [shape: f32[2,10], index: 5, kind: output, shape index: {}]  }
   0x1   :  { %v26_v0 = vld [vmem:[%s377_s1 + $0x20] sm:$0xf]  ;;  %v24_v1 = vld [vmem:[%s377_s1 + $0x10] sm:$0xff]  ;;  %v27_v2 = vld [vmem:[%s377_s1 + $0x28] sm:$0xf] }
   0x2   :  { %183 = vmatpush.msk.msra.mxu0 %vm38_vm0, %v26_v0  ;;  %v25_v3 = vld [vmem:[%s377_s1 + $0x18] sm:$0xff]  ;;  %185 = vmatpush.msk.msra.mxu1 %vm38_vm0, %v27_v2  ;;  %v22_v4 = vld [vmem:[%s377_s1] sm:$0xff]  ;;  %v23_v7 = vld [vmem:[%s377_s1 + $0x8] sm:$0xff] }
   0x3   :  { %v21_v5 = vld [vmem:[%s376_s0] sm:$0xff]  ;;  %v102_v6 = vld [vmem:[%s379_s3 + $0x78] sm:$0xff]  ;;  %v101_v8 = vld [vmem:[%s379_s3 + $0x70] sm:$0xff] }
   0x4   :  { %59 = vmatpush.msra.mxu0 %v24_v1  ;;  %123 = vmatpush.msra.mxu2 %v102_v6  ;;  %v118_v9 = vld [vmem:[%s379_s3 + $0xf8] sm:$0xff]  ;;  %v100_v10 = vld [vmem:[%s379_s3 + $0x68] sm:$0xff]  ;;  %v117_v11 = vld [vmem:[%s379_s3 + $0xf0] sm:$0xff] }
   0x5   :  { %79 = vmatpush.msra.mxu1 %v25_v3  ;;  %143 = vmatpush.msra.mxu3 %v118_v9  ;;  %v99_v12 = vld [vmem:[%s379_s3 + $0x60] sm:$0xff]  ;;  %v116_v13 = vld [vmem:[%s379_s3 + $0xe8] sm:$0xff]  ;;  %v98_v14 = vld [vmem:[%s379_s3 + $0x58] sm:$0xff] }
   0x6   :  { %60 = vmatpush.msra.mxu0 %v22_v4  ;;  %124 = vmatpush.msra.mxu2 %v101_v8  ;;  %v115_v15 = vld [vmem:[%s379_s3 + $0xe0] sm:$0xff]  ;;  %v97_v16 = vld [vmem:[%s379_s3 + $0x50] sm:$0xff]  ;;  %v114_v17 = vld [vmem:[%s379_s3 + $0xd8] sm:$0xff] }
   0x7   :  { %184 = vmatmul.msk.f32.vlgmr.msra.gmra.mxu0 %vm34_vm1, %v21_v5  ;;  %80 = vmatpush.msra.mxu1 %v23_v7  ;;  %v96_v18 = vld [vmem:[%s379_s3 + $0x48] sm:$0xff]  ;;  %v113_v19 = vld [vmem:[%s379_s3 + $0xd0] sm:$0xff]  ;;  %v95_v20 = vld [vmem:[%s379_s3 + $0x40] sm:$0xff] }
   0x8   :  { %186 = vmatmul.msk.f32.vlgmr.msra.gmra.mxu1 %vm34_vm1, %v21_v5  ;;  %125 = vmatpush.msra.mxu2 %v100_v10  ;;  %v112_v21 = vld [vmem:[%s379_s3 + $0xc8] sm:$0xff]  ;;  %v94_v22 = vld [vmem:[%s379_s3 + $0x38] sm:$0xff]  ;;  %v111_v23 = vld [vmem:[%s379_s3 + $0xc0] sm:$0xff] }
   0x9   :  { %144 = vmatpush.msra.mxu3 %v117_v11  ;;  %v93_v24 = vld [vmem:[%s379_s3 + $0x30] sm:$0xff]  ;;  %v110_v25 = vld [vmem:[%s379_s3 + $0xb8] sm:$0xff]  ;;  %v92_v26 = vld [vmem:[%s379_s3 + $0x28] sm:$0xff] }
   0xa   :  { %126 = vmatpush.msra.mxu2 %v99_v12  ;;  %v109_v27 = vld [vmem:[%s379_s3 + $0xb0] sm:$0xff]  ;;  %v91_v28 = vld [vmem:[%s379_s3 + $0x20] sm:$0xff]  ;;  %v108_v29 = vld [vmem:[%s379_s3 + $0xa8] sm:$0xff] }
   0xb   :  { %145 = vmatpush.msra.mxu3 %v116_v13  ;;  %v90_v30 = vld [vmem:[%s379_s3 + $0x18] sm:$0xff]  ;;  %v107_v31 = vld [vmem:[%s379_s3 + $0xa0] sm:$0xff]  ;;  %v89_v32 = vld [vmem:[%s379_s3 + $0x10] sm:$0xff] }
   0xc   :  { %127 = vmatpush.msra.mxu2 %v98_v14  ;;  %v106_v33 = vld [vmem:[%s379_s3 + $0x98] sm:$0xff]  ;;  %v88_v34 = vld [vmem:[%s379_s3 + $0x8] sm:$0xff]  ;;  %v105_v35 = vld [vmem:[%s379_s3 + $0x90] sm:$0xff] }
   0xd   :  { %146 = vmatpush.msra.mxu3 %v115_v15  ;;  %v87_v36 = vld [vmem:[%s379_s3] sm:$0xff]  ;;  %v104_v37 = vld [vmem:[%s379_s3 + $0x88] sm:$0xff] }
   0xe   :  { %128 = vmatpush.msra.mxu2 %v97_v16  ;;  %v103_v38 = vld [vmem:[%s379_s3 + $0x80] sm:$0xff] }
   0xf   :  { %147 = vmatpush.msra.mxu3 %v114_v17  ;;  %v28_v39 = vld [vmem:[%s378_s2] sm:$0x3] }
  0x10   :  { %129 = vmatpush.msra.mxu2 %v96_v18  ;;  %v30_v40 = vperm.slane %v28_v39, 0  ;;  %v31_v41 = vperm.slane %v28_v39, 1  ;;  %v190_v48 = vld [vmem:[%s380_s4] ss:$0 sm:$0xff] }
  0x11   :  { %148 = vmatpush.msra.mxu3 %v113_v19 }
  0x12   :  { %130 = vmatpush.msra.mxu2 %v95_v20 }
  0x13   :  { %149 = vmatpush.msra.mxu3 %v112_v21 }
  0x14   :  { %131 = vmatpush.msra.mxu2 %v94_v22 }
  0x15   :  { %150 = vmatpush.msra.mxu3 %v111_v23 }
  0x16   :  { %132 = vmatpush.msra.mxu2 %v93_v24 }
  0x17   :  { %151 = vmatpush.msra.mxu3 %v110_v25 }
  0x18   :  { %133 = vmatpush.msra.mxu2 %v92_v26 }
  0x19   :  { %152 = vmatpush.msra.mxu3 %v109_v27 }
  0x1a   :  { %134 = vmatpush.msra.mxu2 %v91_v28 }
  0x1b   :  { %153 = vmatpush.msra.mxu3 %v108_v29 }
  0x1c   :  { %135 = vmatpush.msra.mxu2 %v90_v30 }
  0x1d   :  { %154 = vmatpush.msra.mxu3 %v107_v31 }
  0x1e   :  { %136 = vmatpush.msra.mxu2 %v89_v32 }
  0x1f   :  { %155 = vmatpush.msra.mxu3 %v106_v33 }
  0x20   :  { %137 = vmatpush.msra.mxu2 %v88_v34 }
  0x21   :  { %156 = vmatpush.msra.mxu3 %v105_v35 }
  0x22   :  { %138 = vmatpush.msra.mxu2 %v87_v36 }
  0x23   :  { %157 = vmatpush.msra.mxu3 %v104_v37 }
  0x25   :  { %158 = vmatpush.msra.mxu3 %v103_v38 }
  0x84   :  { %v62_v42 = vpop.f32.mrf.mxu0 }
  0x85   :  { %v63_v43 = vadd.f32 %v62_v42, %v30_v40  ;;  %v82_v44 = vpop.f32.mrf.mxu1 }
  0x86   :  { %v83_v45 = vadd.f32 %v82_v44, %v31_v41 }
  0x87   :  { %v85_v46 = vmax.f32 %v63_v43, 0.0 }
  0x88   :  { %v86_v47 = vmax.f32 %v83_v45, 0.0 }
  0x89   :  { %139 = vmatmul.f32.vlgmr.msra.gmra.mxu2 %v85_v46 }
  0x8a   :  { %159 = vmatmul.f32.vlgmr.msra.gmra.mxu3 %v86_v47 }
 0x10c   :  { %v140_v49 = vpop.f32.mrf.mxu2 }
 0x10d   :  { %v141_v50 = vadd.f32 %v190_v48, %v140_v49  ;;  %v160_v51 = vpop.f32.mrf.mxu3 }
 0x10f   :  { %v161_v52 = vadd.f32 %v160_v51, %v141_v50 }
 0x111   :  { %164 = vst.msk [vmem:[#allocation2] sm:$0xff] %vm163_vm2, %v161_v52 }
 0x112   :  { %168 = vsyncadd [#allocation3], 96  ;;  %s171_s19 = sshll.u32 %s381_s5, 4  ;;  %s217_s20 = smov [#allocation2]   ;;  %s172_s19 = int_to_ptr.hbm [resolvable:$true] %s171_s19 }
 0x113   :  { %s169_s21 = sshll.u32 %s217_s20, 4  ;;  %s218_s22 = smov 32   ;;  %s170_s21 = int_to_ptr.vmem [resolvable:$true] %s169_s21 }
 0x114   :  { %s219_s23 = smov 2  }
 0x115   :  { %177 = dma.vmem_to_hbm [thread:$0]  %s170_s21, 32, %s172_s19, [#allocation3], %s218_s22, %s218_s22, %s219_s23  }
 0x116   :  { %215 = dma.done.wait [#allocation3], 128  }
 0x117   :  { %216 = vsyncadd [#allocation3], 4294967168 }
 0x118   :  { %182 = vsyncpa [#allocation3], 1 }

</bundles_post_ra>
